<compile_context>
chip_gen: v6e
topology: v6e:2x2x1
jax: 0.10.0
libtpu: 0.0.40
codegen_flags: <defaults>
</compile_context>

<pallas_src>
import functools

import jax
import jax.numpy as jnp
from jax.experimental import pallas as pl
from jax.experimental.pallas import tpu as pltpu


def _round_up(x, m):
    return (x + m - 1) // m * m


def _mlp_head_kernel(x_ref, w1_ref, b1_ref, w2_ref, b2_ref, o_ref, *, eps,
                     compute_dtype):
    # In-kernel cast of the activation tile to the MXU dtype (free VPU pack,
    # hidden under the matmul); weights were cast once in the wrapper.
    xv = x_ref[...].astype(compute_dtype)

    # fc1 on the MXU: bf16 operands, f32 accumulation.
    h = jnp.dot(xv, w1_ref[...], preferred_element_type=jnp.float32)
    h = h + b1_ref[...]

    # SquaredReLU (f32 elementwise path).
    h = jnp.maximum(h, 0.0)
    h = h * h

    # LayerNorm over the hidden (last) dim, two-pass statistics (matches the
    # PyTorch biased-variance LayerNorm and avoids E[h^2]-E[h]^2 cancellation).
    mean = jnp.mean(h, axis=-1, keepdims=True)
    hc = h - mean
    var = jnp.mean(hc * hc, axis=-1, keepdims=True)
    hn = hc * jax.lax.rsqrt(var + eps)

    # LN affine (gamma/beta) is folded into w2/b2 in the wrapper.
    # head_dropout has p=0.0 -> identity.

    # fc2 on the MXU: cast normalized activations to the weight dtype (bf16).
    out = jnp.dot(hn.astype(compute_dtype), w2_ref[...],
                  preferred_element_type=jnp.float32)
    out = out + b2_ref[...]
    o_ref[...] = out.astype(o_ref.dtype)


def mlp_head(x, w1, b1, gamma, beta, w2, b2, *, eps=1e-5, block_b=None,
             compute_dtype=jnp.bfloat16, out_dtype=None):
    """x: (N, D); w1: (D, H); b1: (H,); gamma/beta: (H,); w2: (H, C); b2: (C,).

    Weights are stored transposed vs. PyTorch (as (in, out)) so the kernel computes
    x @ W directly on the MXU.
    """
    N, D = x.shape
    H = w1.shape[1]
    C = w2.shape[1]
    out_dtype = x.dtype if out_dtype is None else out_dtype

    # Sublane alignment for the batch tile: 16 rows for bf16 MXU operands, 8 for f32.
    sublane = 16 if jnp.dtype(compute_dtype) == jnp.bfloat16 else 8
    if block_b is None:
        # Big tiles amortize the ~0.35us per-grid-step overhead, but keep >= 4 grid
        # steps so v7x's two TensorCores each get >= 2 steps of pipelined work.
        target = max(sublane, pl.cdiv(N, 4))
        block_b = min(512, _round_up(target, sublane))
    block_b = max(sublane, _round_up(block_b, sublane))
    grid = pl.cdiv(N, block_b)   # trailing partial block is masked by Pallas

    # Fold the LayerNorm affine into fc2:
    #   (hn*g + b) @ W2 + b2 = hn @ (g[:,None]*W2) + (b @ W2 + b2)
    w2_eff = gamma[:, None].astype(jnp.float32) * w2.astype(jnp.float32)
    b2_eff = (beta.astype(jnp.float32) @ w2.astype(jnp.float32)
              + b2.astype(jnp.float32))

    w1_c = w1.astype(compute_dtype)
    w2_c = w2_eff.astype(compute_dtype)
    b1_2d = b1.astype(jnp.float32).reshape(1, H)
    b2_2d = b2_eff.reshape(1, C)

    kernel = functools.partial(_mlp_head_kernel, eps=eps,
                               compute_dtype=compute_dtype)

    wdt = jnp.dtype(compute_dtype).itemsize
    xdt = jnp.dtype(x.dtype).itemsize
    odt = jnp.dtype(out_dtype).itemsize

    # Advisory cost for the XLA scheduler (kept consistent with actual traffic:
    # x read once at native width, unpadded narrow output).
    cost = pl.CostEstimate(
        flops=2 * N * D * H + 2 * N * H * C + 7 * N * H,
        transcendentals=N,  # one rsqrt per row
        bytes_accessed=(N * D * xdt + D * H * wdt + H * C * wdt
                        + H * 4 + C * 4 + N * C * odt),
    )

    # Real VMEM footprint (double-buffered x/out tiles, single-buffered weights,
    # f32 intermediates), then ~2x headroom, clamped to [8 MiB, 32 MiB].
    resident_bytes = (
        2 * block_b * D * xdt        # x tiles (double-buffered)
        + 2 * block_b * C * odt      # output tiles (double-buffered)
        + (D * H + H * C) * wdt      # weights (single-buffered)
        + (H + C) * 4                # biases
        + 4 * block_b * H * 4        # f32 intermediates h / hc / hn / scratch
        + block_b * C * 4)           # f32 fc2 accumulator
    vmem_limit = int(min(max(2 * resident_bytes, 8 * 1024 * 1024),
                         32 * 1024 * 1024))

    const_mode = pl.Buffered(1)  # weights/biases never change: no double-buffer

    out = pl.pallas_call(
        kernel,
        out_shape=jax.ShapeDtypeStruct((N, C), out_dtype),
        grid_spec=pltpu.PrefetchScalarGridSpec(
            num_scalar_prefetch=0,
            grid=(grid,),
            in_specs=[
                pl.BlockSpec((block_b, D), lambda i: (i, 0)),   # x tile (pipelined)
                pl.BlockSpec((D, H), lambda i: (0, 0), pipeline_mode=const_mode),
                pl.BlockSpec((1, H), lambda i: (0, 0), pipeline_mode=const_mode),
                pl.BlockSpec((H, C), lambda i: (0, 0), pipeline_mode=const_mode),
                pl.BlockSpec((1, C), lambda i: (0, 0), pipeline_mode=const_mode),
            ],
            # Full (unpadded) class dim as the output block: masked store, but
            # 8x less HBM traffic than lane-dense pad+slice for small C.
            out_specs=pl.BlockSpec((block_b, C), lambda i: (i, 0)),
        ),
        compiler_params=pltpu.CompilerParams(
            dimension_semantics=("parallel",),
            vmem_limit_bytes=vmem_limit,
        ),
        cost_estimate=cost,
    )(x, w1_c, b1_2d, w2_c, b2_2d)

    return out


def mlp_head_ref(x, w1, b1, gamma, beta, w2, b2, eps=1e-5):
    """Pure-f32 reference matching the PyTorch module semantics."""
    h = x @ w1 + b1
    h = jnp.square(jnp.maximum(h, 0.0))
    mean = jnp.mean(h, axis=-1, keepdims=True)
    var = jnp.mean(jnp.square(h - mean), axis=-1, keepdims=True)
    hn = (h - mean) / jnp.sqrt(var + eps)
    hn = hn * gamma + beta
    return hn @ w2 + b2


def mlp_head_matched_ref(x, w1, b1, gamma, beta, w2, b2, eps=1e-5,
                         compute_dtype=jnp.bfloat16):
    """Reference mirroring the kernel's exact numerics (bf16 MXU operands,
    f32 accumulation, folded LN affine, two-pass variance)."""
    h = jnp.dot(x.astype(compute_dtype), w1.astype(compute_dtype),
                preferred_element_type=jnp.float32) + b1
    h = jnp.maximum(h, 0.0)
    h = h * h
    mean = jnp.mean(h, axis=-1, keepdims=True)
    hc = h - mean
    var = jnp.mean(hc * hc, axis=-1, keepdims=True)
    hn = hc * jax.lax.rsqrt(var + eps)
    w2_eff = (gamma[:, None] * w2).astype(compute_dtype)
    b2_eff = beta @ w2 + b2
    return jnp.dot(hn.astype(compute_dtype), w2_eff,
                   preferred_element_type=jnp.float32) + b2_eff


if __name__ == "__main__":
    # Shapes consistent with the module: dim=32, mlp_ratio=4 -> hidden=128,
    # num_classes=16. batch=512 with the auto tile (128 rows) yields a 4-step grid
    # (>= 2 pipelined steps per TensorCore on v7x).
    batch, dim, num_classes, mlp_ratio = 512, 32, 16, 4
    hidden = mlp_ratio * dim

    key = jax.random.PRNGKey(0)
    kx, k1, kb1, kg, kbt, k2, kb2 = jax.random.split(key, 7)

    x = jax.random.normal(kx, (batch, dim), dtype=jnp.float32)

    # Deterministic synthetic parameters (shapes per nn.Linear / nn.LayerNorm).
    w1 = jax.random.normal(k1, (dim, hidden), dtype=jnp.float32) * 0.05
    b1 = jax.random.normal(kb1, (hidden,), dtype=jnp.float32) * 0.05
    gamma = 1.0 + 0.1 * jax.random.normal(kg, (hidden,), dtype=jnp.float32)
    beta = 0.05 * jax.random.normal(kbt, (hidden,), dtype=jnp.float32)
    w2 = jax.random.normal(k2, (hidden, num_classes), dtype=jnp.float32) * 0.05
    b2 = jax.random.normal(kb2, (num_classes,), dtype=jnp.float32) * 0.05

    out = mlp_head(x, w1, b1, gamma, beta, w2, b2)
    out = jax.block_until_ready(out)
    assert out.shape == (batch, num_classes)
    assert out.dtype == x.dtype

    # 1) Strict check against a reference with identical numerics (bf16 MXU ops).
    ref_matched = mlp_head_matched_ref(x, w1, b1, gamma, beta, w2, b2)
    assert jnp.allclose(out, ref_matched, atol=2e-3, rtol=2e-3), \
        "mismatch vs numerics-matched reference"

    # 2) Loose check against the pure-f32 module semantics (bf16-vs-f32 tolerance).
    ref_f32 = mlp_head_ref(x, w1, b1, gamma, beta, w2, b2)
    assert jnp.allclose(out, ref_f32, atol=1e-1, rtol=1e-1), \
        "mismatch vs f32 module reference"

    print("KERNEL_OK")
</pallas_src>

<mosaic_0001>
module attributes {stable_mosaic.version = 11 : i64} {
  func.func @_mlp_head_kernel(%arg0: i32, %arg1: memref<128x32xf32, #tpu.memory_space<vmem>>, %arg2: memref<32x128xbf16, #tpu.memory_space<vmem>>, %arg3: memref<1x128xf32, #tpu.memory_space<vmem>>, %arg4: memref<128x16xbf16, #tpu.memory_space<vmem>>, %arg5: memref<1x16xf32, #tpu.memory_space<vmem>>, %arg6: memref<128x16xf32, #tpu.memory_space<vmem>>) attributes {dimension_semantics = [#tpu.dimension_semantics<parallel>], iteration_bounds = array<i64: 4>, scalar_prefetch = 0 : i64, scratch_operands = 0 : i64, tpu.core_type = #tpu.core_type<tc>, window_params = [{transform_indices = @transform_0, window_bounds = array<i64: 128, 32>}, {pipeline_mode = #tpu.pipeline_mode<synchronous>, transform_indices = @transform_1, window_bounds = array<i64: 32, 128>}, {pipeline_mode = #tpu.pipeline_mode<synchronous>, transform_indices = @transform_2, window_bounds = array<i64: 1, 128>}, {pipeline_mode = #tpu.pipeline_mode<synchronous>, transform_indices = @transform_3, window_bounds = array<i64: 128, 16>}, {pipeline_mode = #tpu.pipeline_mode<synchronous>, transform_indices = @transform_4, window_bounds = array<i64: 1, 16>}, {transform_indices = @transform_5, window_bounds = array<i64: 128, 16>}]} {
    %c0 = arith.constant 0 : index
    %c0_0 = arith.constant 0 : index
    %0 = vector.load %arg1[%c0, %c0_0] : memref<128x32xf32, #tpu.memory_space<vmem>>, vector<128x32xf32>
    %1 = arith.truncf %0 : vector<128x32xf32> to vector<128x32xbf16>
    %c0_1 = arith.constant 0 : index
    %c0_2 = arith.constant 0 : index
    %2 = vector.load %arg2[%c0_1, %c0_2] : memref<32x128xbf16, #tpu.memory_space<vmem>>, vector<32x128xbf16>
    %cst = arith.constant dense<0.000000e+00> : vector<128x128xf32>
    %3 = tpu.matmul %1, %2, %cst {dimension_numbers = #tpu.dot_dimension_numbers<[1], [0], [0], [1], [0, 0, 1, 1], [], []>} : vector<128x32xbf16>, vector<32x128xbf16>, vector<128x128xf32> -> vector<128x128xf32>
    %c0_3 = arith.constant 0 : index
    %c0_4 = arith.constant 0 : index
    %4 = vector.load %arg3[%c0_3, %c0_4] : memref<1x128xf32, #tpu.memory_space<vmem>>, vector<1x128xf32>
    %5 = vector.broadcast %4 : vector<1x128xf32> to vector<128x128xf32>
    %6 = arith.addf %3, %5 : vector<128x128xf32>
    %cst_5 = arith.constant 0.000000e+00 : f32
    %7 = vector.broadcast %cst_5 : f32 to vector<128x128xf32>
    %8 = arith.maximumf %6, %7 : vector<128x128xf32>
    %9 = arith.mulf %8, %8 : vector<128x128xf32>
    %cst_6 = arith.constant dense<0.000000e+00> : vector<128xf32>
    %10 = vector.multi_reduction <add>, %9, %cst_6 [1] : vector<128x128xf32> to vector<128xf32>
    %11 = vector.shape_cast %10 : vector<128xf32> to vector<128x1xf32>
    %cst_7 = arith.constant 1.280000e+02 : f32
    %12 = vector.broadcast %cst_7 : f32 to vector<128x1xf32>
    %13 = arith.divf %11, %12 : vector<128x1xf32>
    %14 = vector.broadcast %13 : vector<128x1xf32> to vector<128x128xf32>
    %15 = arith.subf %9, %14 : vector<128x128xf32>
    %16 = arith.mulf %15, %15 : vector<128x128xf32>
    %cst_8 = arith.constant dense<0.000000e+00> : vector<128xf32>
    %17 = vector.multi_reduction <add>, %16, %cst_8 [1] : vector<128x128xf32> to vector<128xf32>
    %18 = vector.shape_cast %17 : vector<128xf32> to vector<128x1xf32>
    %cst_9 = arith.constant 1.280000e+02 : f32
    %19 = vector.broadcast %cst_9 : f32 to vector<128x1xf32>
    %20 = arith.divf %18, %19 : vector<128x1xf32>
    %cst_10 = arith.constant 9.99999974E-6 : f32
    %21 = vector.broadcast %cst_10 : f32 to vector<128x1xf32>
    %22 = arith.addf %20, %21 : vector<128x1xf32>
    %23 = math.rsqrt %22 : vector<128x1xf32>
    %24 = vector.broadcast %23 : vector<128x1xf32> to vector<128x128xf32>
    %25 = arith.mulf %15, %24 : vector<128x128xf32>
    %26 = arith.truncf %25 : vector<128x128xf32> to vector<128x128xbf16>
    %c0_11 = arith.constant 0 : index
    %c0_12 = arith.constant 0 : index
    %27 = vector.load %arg4[%c0_11, %c0_12] : memref<128x16xbf16, #tpu.memory_space<vmem>>, vector<128x16xbf16>
    %cst_13 = arith.constant dense<0.000000e+00> : vector<128x16xf32>
    %28 = tpu.matmul %26, %27, %cst_13 {dimension_numbers = #tpu.dot_dimension_numbers<[1], [0], [0], [1], [0, 0, 1, 1], [], []>} : vector<128x128xbf16>, vector<128x16xbf16>, vector<128x16xf32> -> vector<128x16xf32>
    %c0_14 = arith.constant 0 : index
    %c0_15 = arith.constant 0 : index
    %29 = vector.load %arg5[%c0_14, %c0_15] : memref<1x16xf32, #tpu.memory_space<vmem>>, vector<1x16xf32>
    %30 = vector.broadcast %29 : vector<1x16xf32> to vector<128x16xf32>
    %31 = arith.addf %28, %30 : vector<128x16xf32>
    %c0_16 = arith.constant 0 : index
    %c0_17 = arith.constant 0 : index
    %32 = vector.load %arg6[%c0_16, %c0_17] : memref<128x16xf32, #tpu.memory_space<vmem>>, vector<128x16xf32>
    tpu.vector_store %arg6[%c0_16, %c0_17], %31 {strides = array<i32>} : memref<128x16xf32, #tpu.memory_space<vmem>>, vector<128x16xf32>,
    return
  }
  func.func @transform_0(%arg0: i32) -> (i32, i32) {
    %c0_i32 = arith.constant 0 : i32
    %c0_i32_0 = arith.constant 0 : i32
    return %arg0, %c0_i32 : i32, i32
  }
  func.func @transform_1(%arg0: i32) -> (i32, i32) {
    %c0_i32 = arith.constant 0 : i32
    %c0_i32_0 = arith.constant 0 : i32
    %c0_i32_1 = arith.constant 0 : i32
    return %c0_i32, %c0_i32_0 : i32, i32
  }
  func.func @transform_2(%arg0: i32) -> (i32, i32) {
    %c0_i32 = arith.constant 0 : i32
    %c0_i32_0 = arith.constant 0 : i32
    %c0_i32_1 = arith.constant 0 : i32
    return %c0_i32, %c0_i32_0 : i32, i32
  }
  func.func @transform_3(%arg0: i32) -> (i32, i32) {
    %c0_i32 = arith.constant 0 : i32
    %c0_i32_0 = arith.constant 0 : i32
    %c0_i32_1 = arith.constant 0 : i32
    return %c0_i32, %c0_i32_0 : i32, i32
  }
  func.func @transform_4(%arg0: i32) -> (i32, i32) {
    %c0_i32 = arith.constant 0 : i32
    %c0_i32_0 = arith.constant 0 : i32
    %c0_i32_1 = arith.constant 0 : i32
    return %c0_i32, %c0_i32_0 : i32, i32
  }
  func.func @transform_5(%arg0: i32) -> (i32, i32) {
    %c0_i32 = arith.constant 0 : i32
    %c0_i32_0 = arith.constant 0 : i32
    return %arg0, %c0_i32 : i32, i32
  }
}

</mosaic_0001>

<bundles_post_ra>
// kernel: tpu_custom_call.1
= control target key start
LH: loop header
LB: loop body
LE: loop exit
PB: predicated region body
PF: predicated region fallthrough
CT: control target
= control target key end

     0   :  { %s1069_s18 = smov 0   ;;  %s1351_s0 = inlined_call_operand.vmem [shape: f32[512,32], index: 0, kind: input, shape index: {}]   ;;  %s1352_s1 = inlined_call_operand.vmem [shape: bf16[32,128], index: 1, kind: input, shape index: {}]   ;;  %s1353_s2 = inlined_call_operand.vmem [shape: f32[1,128], index: 2, kind: input, shape index: {}]   ;;  %s1354_s3 = inlined_call_operand.vmem [shape: bf16[128,16], index: 3, kind: input, shape index: {}]   ;;  %s1355_s4 = inlined_call_operand.vmem [shape: f32[1,16], index: 4, kind: input, shape index: {}]   ;;  %s1356_s5 = inlined_call_operand.vmem [shape: f32[512,16], index: 5, kind: output, shape index: {}]  }
   0x1 LB: > { %s856_s19 = sadd.s32 4294967295, %s1037_s18   ;;  %p860_p0 = scmp.ge.s32.totalorder %s1037_s18, 1  ;;  %s1037_s18 = sphi %s1069_s18, %s15_s18  }
   0x2   : > { %p188_p1 = scmp.lt.s32.totalorder %s1037_s18, 5 }
   0x4   : > { %p189_p2 = pnand %p860_p0, %p188_p1 }
   0x5   : > { %s861_s22 = sshll.u32 (!%p189_p2), %s856_s19, 4 }
   0x6   : > { %192 = sbr.rel (%p189_p2) target bundleno = 763 (0x2fb), region = 40  ;;  %p217_p3 = scmp.lt.s32.totalorder (!%p189_p2), %s861_s22, 63 }
   0xb   : > { %v989_v0 = vld [vmem:[%s1352_s1 + $0x8] sm:$0xff]   ;;  %v990_v1 = vld [vmem:[%s1352_s1] sm:$0xff]   ;;  %s1358_s22 = smov (!%p217_p3, %s861_s22), 63  ;;  %vm276_vm0 = vcmask 261120   ;;  %vm783_vm1 = vcmask 130048  }
   0xc   : > { %913 = vmatprep.subr.bf16.mxu0 %v989_v0  ;;  %s862_s25 = sshll.u32 %s1358_s22, 3  ;;  %v1120_v27 = vld [vmem:[%s1353_s2] ss:$0 sm:$0xff] }
   0xd   : > { %914 = vmatpush3.bf16.msra.mxu0 %v989_v0  ;;  %s1091_s28 = scalar_lea.vmem %s1351_s0, %s862_s25  ;;  %s1314_s29 = scalar_lea.vmem %s1356_s5, %s862_s25 }
   0xe   : > { %915 = vmatprep.subr.bf16.mxu0 %v990_v1  ;;  %v229_v2 = vld [vmem:[%s1091_s28] sm:$0xff]  ;;  %v230_v3 = vld [vmem:[%s1091_s28 + $0x8] sm:$0xff]  ;;  %v231_v4 = vld [vmem:[%s1091_s28 + $0x10] sm:$0xff] }
   0xf   : > { %v245_v5 = vpack.c.bf16 %v230_v3, %v229_v2  ;;  %v232_v6 = vld [vmem:[%s1091_s28 + $0x18] sm:$0xff]  ;;  %v233_v7 = vld [vmem:[%s1091_s28 + $0x20] sm:$0xff]  ;;  %v234_v8 = vld [vmem:[%s1091_s28 + $0x28] sm:$0xff] }
  0x10   : > { %v246_v9 = vpack.c.bf16 %v232_v6, %v231_v4  ;;  %v247_v10 = vpack.c.bf16 %v234_v8, %v233_v7  ;;  %v235_v11 = vld [vmem:[%s1091_s28 + $0x30] sm:$0xff]  ;;  %v236_v12 = vld [vmem:[%s1091_s28 + $0x38] sm:$0xff]  ;;  %v237_v13 = vld [vmem:[%s1091_s28 + $0x40] sm:$0xff] }
  0x11   : > { %916 = vmatpush3.bf16.msra.mxu0 %v990_v1  ;;  %917 = vmatprep.mubr.msk.bf16.mxu0 %vm276_vm0, %v245_v5  ;;  %v238_v14 = vld [vmem:[%s1091_s28 + $0x48] sm:$0xff]  ;;  %v248_v15 = vpack.c.bf16 %v236_v12, %v235_v11  ;;  %v239_v17 = vld [vmem:[%s1091_s28 + $0x50] sm:$0xff]  ;;  %v240_v18 = vld [vmem:[%s1091_s28 + $0x58] sm:$0xff] }
  0x12   : > { %v249_v16 = vpack.c.bf16 %v238_v14, %v237_v13  ;;  %v241_v19 = vld [vmem:[%s1091_s28 + $0x60] sm:$0xff]  ;;  %v242_v20 = vld [vmem:[%s1091_s28 + $0x68] sm:$0xff]  ;;  %v250_v21 = vpack.c.bf16 %v240_v18, %v239_v17  ;;  %v243_v23 = vld [vmem:[%s1091_s28 + $0x70] sm:$0xff] }
  0x13   : > { %v251_v22 = vpack.c.bf16 %v242_v20, %v241_v19  ;;  %v244_v24 = vld [vmem:[%s1091_s28 + $0x78] sm:$0xff] }
  0x14   : > { %918 = vmatmul.mubr.msk.bf16.vlgmr.msra.gmra.mxu0 %vm276_vm0, %v246_v9  ;;  %v252_v25 = vpack.c.bf16 %v244_v24, %v243_v23 }
  0x15   : > { %921 = vmatprep.mubr.msk.bf16.mxu0 %vm276_vm0, %v247_v10 }
  0x1c   : > { %922 = vmatmul.mubr.msk.bf16.gmra.mxu0 %vm276_vm0, %v248_v15 }
  0x1d   : > { %925 = vmatprep.mubr.msk.bf16.mxu0 %vm276_vm0, %v249_v16 }
  0x24   : > { %926 = vmatmul.mubr.msk.bf16.gmra.mxu0 %vm276_vm0, %v250_v21 }
  0x25   : > { %929 = vmatprep.mubr.msk.bf16.mxu0 %vm276_vm0, %v251_v22 }
  0x2c   : > { %930 = vmatmul.mubr.msk.bf16.gmra.mxu0 %vm276_vm0, %v252_v25 }
  0xd4   : > { %v919_v26 = vpop.f32.mrf.mxu0 }
  0xd5   : > { %v344_v62 = vadd.f32 %v919_v26, %v1120_v27 }
  0xd6   : > { %v335_v28 = vpop.f32.mrf.mxu0 }
  0xd7   : > { %v336_v29 = vadd.f32 %v1120_v27, %v335_v28  ;;  %v400_v7 = vmax.f32 %v344_v62, 0.0 }
  0xd8   : > { %v920_v30 = vpop.f32.mrf.mxu0 }
  0xd9   : > { %v398_v31 = vmax.f32 %v336_v29, 0.0  ;;  %v347_v3 = vadd.f32 %v920_v30, %v1120_v27  ;;  %v1167_v17 = vmul.f32 %v400_v7, %v400_v7 }
  0xda   : > { %v338_v32 = vpop.f32.mrf.mxu0 }
  0xdb   : > { %v339_v33 = vadd.f32 %v1120_v27, %v338_v32  ;;  %v1124_v34 = vmul.f32 %v398_v31, %v398_v31  ;;  %v401_v11 = vmax.f32 %v347_v3, 0.0 }
  0xdc   : > { %v923_v35 = vpop.f32.mrf.mxu0 }
  0xdd   : > { %v399_v36 = vmax.f32 %v339_v33, 0.0  ;;  %v360_v37 = vadd.f32 %v923_v35, %v1120_v27  ;;  %430 = vadd.xlane.f32.xlu0 %v1124_v34  ;;  %v1171_v20 = vmul.f32 %v401_v11, %v401_v11 }
  0xde   : > { %v351_v38 = vpop.f32.mrf.mxu0 }
  0xdf   : > { %v404_v39 = vmax.f32 %v360_v37, 0.0  ;;  %v352_v40 = vadd.f32 %v1120_v27, %v351_v38  ;;  %v1129_v41 = vmul.f32 %v399_v36, %v399_v36 }
  0xe0   : > { %v924_v42 = vpop.f32.mrf.mxu0 }
  0xe1   : > { %v402_v43 = vmax.f32 %v352_v40, 0.0  ;;  %v363_v44 = vadd.f32 %v924_v42, %v1120_v27  ;;  %432 = vadd.xlane.f32.xlu1 %v1129_v41  ;;  %v1133_v45 = vmul.f32 %v404_v39, %v404_v39 }
  0xe2   : > { %v354_v46 = vpop.f32.mrf.mxu0 }
  0xe3   : > { %v405_v47 = vmax.f32 %v363_v44, 0.0  ;;  %v355_v48 = vadd.f32 %v1120_v27, %v354_v46  ;;  %v1136_v49 = vmul.f32 %v402_v43, %v402_v43 }
  0xe4   : > { %v927_v50 = vpop.f32.mrf.mxu0 }
  0xe5   : > { %v403_v51 = vmax.f32 %v355_v48, 0.0  ;;  %v376_v52 = vadd.f32 %v927_v50, %v1120_v27  ;;  %442 = vadd.xlane.f32.xlu1 %v1133_v45  ;;  %438 = vadd.xlane.f32.xlu0 %v1136_v49  ;;  %v1142_v56 = vmul.f32 %v405_v47, %v405_v47 }
  0xe6   : > { %v367_v53 = vpop.f32.mrf.mxu0 }
  0xe7   : > { %v408_v54 = vmax.f32 %v376_v52, 0.0  ;;  %v368_v55 = vadd.f32 %v1120_v27, %v367_v53  ;;  %v1144_v57 = vmul.f32 %v403_v51, %v403_v51 }
  0xe8   : > { %v928_v58 = vpop.f32.mrf.mxu0 }
  0xe9   : > { %v379_v59 = vadd.f32 %v928_v58, %v1120_v27  ;;  %444 = vadd.xlane.f32.xlu1 %v1142_v56  ;;  %440 = vadd.xlane.f32.xlu0 %v1144_v57  ;;  %v1149_v60 = vmul.f32 %v408_v54, %v408_v54  ;;  %v406_v63 = vmax.f32 %v368_v55, 0.0 }
  0xea   : > { %v370_v61 = vpop.f32.mrf.mxu0 }
  0xeb   : > { %v409_v0 = vmax.f32 %v379_v59, 0.0  ;;  %v371_v1 = vadd.f32 %v1120_v27, %v370_v61  ;;  %v1159_v9 = vmul.f32 %v406_v63, %v406_v63 }
  0xec   : > { %v931_v2 = vpop.f32.mrf.mxu0 }
  0xed   : > { %v407_v4 = vmax.f32 %v371_v1, 0.0  ;;  %450 = vadd.xlane.f32.xlu0 %v1149_v60  ;;  %v1155_v5 = vmul.f32 %v409_v0, %v409_v0  ;;  %v392_v14 = vadd.f32 %v931_v2, %v1120_v27 }
  0xee   : > { %v383_v6 = vpop.f32.mrf.mxu0 }
  0xef   : > { %v384_v8 = vadd.f32 %v1120_v27, %v383_v6  ;;  %452 = vadd.xlane.f32.xlu1 %v1155_v5  ;;  %v1162_v12 = vmul.f32 %v407_v4, %v407_v4  ;;  %v412_v21 = vmax.f32 %v392_v14, 0.0  ;;  %v992_v6 = vld [vmem:[%s1354_s3 + $0x30] sm:$0xff]  }
  0xf0   : > { %v932_v10 = vpop.f32.mrf.mxu0 }
  0xf1   : > { %446 = vadd.xlane.f32.xlu0 %v1159_v9  ;;  %v410_v15 = vmax.f32 %v384_v8, 0.0  ;;  %v395_v18 = vadd.f32 %v932_v10, %v1120_v27  ;;  %v1180_v25 = vmul.f32 %v412_v21, %v412_v21 }
  0xf2   : > { %v386_v13 = vpop.f32.mrf.mxu0 }
  0xf3   : > { %v387_v16 = vadd.f32 %v1120_v27, %v386_v13  ;;  %448 = vadd.xlane.f32.xlu1 %v1162_v12  ;;  %v1174_v22 = vmul.f32 %v410_v15, %v410_v15  ;;  %v413_v23 = vmax.f32 %v395_v18, 0.0 }
  0xf5   : > { %v411_v19 = vmax.f32 %v387_v16, 0.0  ;;  %434 = vadd.xlane.f32.xlu0 %v1167_v17  ;;  %v1183_v26 = vmul.f32 %v413_v23, %v413_v23 }
  0xf7   : > { %436 = vadd.xlane.f32.xlu1 %v1171_v20  ;;  %v1177_v24 = vmul.f32 %v411_v19, %v411_v19 }
  0xf9   : > { %454 = vadd.xlane.f32.xlu0 %v1174_v22 }
  0xfb   : > { %456 = vadd.xlane.f32.xlu1 %v1177_v24 }
  0xfd   : > { %458 = vadd.xlane.f32.xlu0 %v1180_v25 }
  0xff   : > { %460 = vadd.xlane.f32.xlu1 %v1183_v26 }
 0x166   : > { %v431_v27 = vpop.xlane.xlu0 %430 }
 0x167   : > { %v463_v28 = vmul.f32 0.0078125, %v431_v27 }
 0x169   : > { %v1187_v29 = vsub.f32 %v1124_v34, %v463_v28 }
 0x16a   : > { %v433_v30 = vpop.xlane.xlu1 %432 }
 0x16b   : > { %v464_v31 = vmul.f32 0.0078125, %v433_v30  ;;  %v495_v32 = vmul.f32 %v1187_v29, %v1187_v29 }
 0x16d   : > { %v1192_v33 = vsub.f32 %v1129_v41, %v464_v31  ;;  %511 = vadd.xlane.f32.xlu0 %v495_v32 }
 0x16e   : > { %v443_v35 = vpop.xlane.xlu1 %442  ;;  %v439_v36 = vpop.xlane.xlu0 %438 }
 0x16f   : > { %v469_v37 = vmul.f32 0.0078125, %v443_v35  ;;  %v467_v38 = vmul.f32 0.0078125, %v439_v36  ;;  %v496_v39 = vmul.f32 %v1192_v33, %v1192_v33  ;;  %v996_v35 = vld [vmem:[%s1354_s3 + $0x10] sm:$0xff]   ;;  %v997_v36 = vld [vmem:[%s1354_s3 + $0x8] sm:$0xff]  }
 0x171   : > { %v1197_v40 = vsub.f32 %v1133_v45, %v469_v37  ;;  %513 = vadd.xlane.f32.xlu1 %v496_v39  ;;  %v1200_v43 = vsub.f32 %v1136_v49, %v467_v38  ;;  %v998_v37 = vld [vmem:[%s1354_s3] sm:$0xff]  }
 0x172   : > { %v445_v34 = vpop.xlane.xlu1 %444  ;;  %v441_v42 = vpop.xlane.xlu0 %440 }
 0x173   : > { %v470_v44 = vmul.f32 0.0078125, %v445_v34  ;;  %v468_v41 = vmul.f32 0.0078125, %v441_v42  ;;  %v501_v46 = vmul.f32 %v1197_v40, %v1197_v40  ;;  %v499_v49 = vmul.f32 %v1200_v43, %v1200_v43 }
 0x175   : > { %v1205_v47 = vsub.f32 %v1142_v56, %v470_v44  ;;  %523 = vadd.xlane.f32.xlu0 %v501_v46  ;;  %v1208_v50 = vsub.f32 %v1144_v57, %v468_v41 }
 0x176   : > { %v451_v48 = vpop.xlane.xlu0 %450 }
 0x177   : > { %v473_v45 = vmul.f32 0.0078125, %v451_v48  ;;  %v502_v51 = vmul.f32 %v1205_v47, %v1205_v47  ;;  %v500_v58 = vmul.f32 %v1208_v50, %v1208_v50 }
 0x178   : > { %v453_v52 = vpop.xlane.xlu1 %452 }
 0x179   : > { %v1215_v53 = vsub.f32 %v1149_v60, %v473_v45  ;;  %v474_v54 = vmul.f32 0.0078125, %v453_v52  ;;  %525 = vadd.xlane.f32.xlu1 %v502_v51  ;;  %519 = vadd.xlane.f32.xlu0 %v499_v49  ;;  %v991_v60 = vld [vmem:[%s1354_s3 + $0x38] sm:$0xff]  }
 0x17a   : > { %v447_v55 = vpop.xlane.xlu0 %446  ;;  %965 = vmatprep.subr.bf16.mxu1 %v991_v60  ;;  %933 = vmatprep.subr.bf16.mxu0 %v991_v60 }
 0x17b   : > { %v1218_v56 = vsub.f32 %v1155_v5, %v474_v54  ;;  %v471_v57 = vmul.f32 0.0078125, %v447_v55  ;;  %v505_v59 = vmul.f32 %v1215_v53, %v1215_v53  ;;  %973 = vmatpush3.bf16.msra.mxu1 %v991_v60  ;;  %934 = vmatpush3.bf16.msra.mxu0 %v991_v60 }
 0x17c   : > { %v449_v61 = vpop.xlane.xlu1 %448  ;;  %966 = vmatprep.subr.bf16.mxu1 %v992_v6  ;;  %935 = vmatprep.subr.bf16.mxu0 %v992_v6 }
 0x17d   : > { %v1228_v62 = vsub.f32 %v1159_v9, %v471_v57  ;;  %v472_v63 = vmul.f32 0.0078125, %v449_v61  ;;  %521 = vadd.xlane.f32.xlu1 %v500_v58  ;;  %531 = vadd.xlane.f32.xlu0 %v505_v59  ;;  %v506_v3 = vmul.f32 %v1218_v56, %v1218_v56 }
 0x17e   : > { %v435_v0 = vpop.xlane.xlu0 %434 }
 0x17f   : > { %v1231_v1 = vsub.f32 %v1162_v12, %v472_v63  ;;  %v465_v2 = vmul.f32 0.0078125, %v435_v0  ;;  %v503_v4 = vmul.f32 %v1228_v62, %v1228_v62  ;;  %974 = vmatpush3.bf16.msra.mxu1 %v992_v6  ;;  %936 = vmatpush3.bf16.msra.mxu0 %v992_v6 }
 0x180   : > { %v437_v5 = vpop.xlane.xlu1 %436 }
 0x181   : > { %v1241_v7 = vsub.f32 %v1167_v17, %v465_v2  ;;  %v466_v8 = vmul.f32 0.0078125, %v437_v5  ;;  %533 = vadd.xlane.f32.xlu1 %v506_v3  ;;  %527 = vadd.xlane.f32.xlu0 %v503_v4  ;;  %v504_v12 = vmul.f32 %v1231_v1, %v1231_v1  ;;  %v993_v17 = vld [vmem:[%s1354_s3 + $0x28] sm:$0xff]  }
 0x182   : > { %v455_v9 = vpop.xlane.xlu0 %454  ;;  %967 = vmatprep.subr.bf16.mxu1 %v993_v17  ;;  %937 = vmatprep.subr.bf16.mxu0 %v993_v17 }
 0x183   : > { %v1244_v10 = vsub.f32 %v1171_v20, %v466_v8  ;;  %v475_v11 = vmul.f32 0.0078125, %v455_v9  ;;  %v497_v13 = vmul.f32 %v1241_v7, %v1241_v7  ;;  %975 = vmatpush3.bf16.msra.mxu1 %v993_v17  ;;  %938 = vmatpush3.bf16.msra.mxu0 %v993_v17 }
 0x184   : > { %v457_v14 = vpop.xlane.xlu1 %456 }
 0x185   : > { %v1251_v15 = vsub.f32 %v1174_v22, %v475_v11  ;;  %v476_v16 = vmul.f32 0.0078125, %v457_v14  ;;  %529 = vadd.xlane.f32.xlu1 %v504_v12  ;;  %515 = vadd.xlane.f32.xlu0 %v497_v13  ;;  %v498_v21 = vmul.f32 %v1244_v10, %v1244_v10 }
 0x186   : > { %v459_v18 = vpop.xlane.xlu0 %458 }
 0x187   : > { %v1257_v19 = vsub.f32 %v1177_v24, %v476_v16  ;;  %v477_v20 = vmul.f32 0.0078125, %v459_v18  ;;  %v507_v23 = vmul.f32 %v1251_v15, %v1251_v15  ;;  %v994_v24 = vld [vmem:[%s1354_s3 + $0x20] sm:$0xff]  }
 0x188   : > { %v461_v22 = vpop.xlane.xlu1 %460  ;;  %968 = vmatprep.subr.bf16.mxu1 %v994_v24  ;;  %939 = vmatprep.subr.bf16.mxu0 %v994_v24 }
 0x189   : > { %v1264_v27 = vsub.f32 %v1180_v25, %v477_v20  ;;  %v478_v28 = vmul.f32 0.0078125, %v461_v22  ;;  %517 = vadd.xlane.f32.xlu1 %v498_v21  ;;  %535 = vadd.xlane.f32.xlu0 %v507_v23  ;;  %v508_v31 = vmul.f32 %v1257_v19, %v1257_v19  ;;  %v995_v25 = vld [vmem:[%s1354_s3 + $0x18] sm:$0xff]  }
 0x18a   : > { %976 = vmatpush3.bf16.msra.mxu1 %v994_v24  ;;  %940 = vmatpush3.bf16.msra.mxu0 %v994_v24 }
 0x18b   : > { %v1270_v30 = vsub.f32 %v1183_v26, %v478_v28  ;;  %v509_v32 = vmul.f32 %v1264_v27, %v1264_v27  ;;  %969 = vmatprep.subr.bf16.mxu1 %v995_v25  ;;  %941 = vmatprep.subr.bf16.mxu0 %v995_v25 }
 0x18d   : > { %537 = vadd.xlane.f32.xlu1 %v508_v31  ;;  %539 = vadd.xlane.f32.xlu0 %v509_v32  ;;  %v510_v26 = vmul.f32 %v1270_v30, %v1270_v30 }
 0x18e   : > { %977 = vmatpush3.bf16.msra.mxu1 %v995_v25  ;;  %942 = vmatpush3.bf16.msra.mxu0 %v995_v25 }
 0x18f   : > { %970 = vmatprep.subr.bf16.mxu1 %v996_v35  ;;  %943 = vmatprep.subr.bf16.mxu0 %v996_v35 }
 0x191   : > { %541 = vadd.xlane.f32.xlu1 %v510_v26 }
 0x192   : > { %978 = vmatpush3.bf16.msra.mxu1 %v996_v35  ;;  %944 = vmatpush3.bf16.msra.mxu0 %v996_v35 }
 0x193   : > { %971 = vmatprep.subr.bf16.mxu1 %v997_v36  ;;  %945 = vmatprep.subr.bf16.mxu0 %v997_v36 }
 0x196   : > { %979 = vmatpush3.bf16.msra.mxu1 %v997_v36  ;;  %946 = vmatpush3.bf16.msra.mxu0 %v997_v36 }
 0x197   : > { %972 = vmatprep.subr.bf16.mxu1 %v998_v37  ;;  %947 = vmatprep.subr.bf16.mxu0 %v998_v37 }
 0x19a   : > { %980 = vmatpush3.bf16.msra.mxu1 %v998_v37  ;;  %948 = vmatpush3.bf16.msra.mxu0 %v998_v37 }
 0x1f6   : > { %v512_v38 = vpop.xlane.xlu0 %511 }
 0x1f7   : > { %v543_v39 = vmul.f32 0.0078125, %v512_v38 }
 0x1f9   : > { %v559_v34 = vadd.f32 1e-05, %v543_v39 }
 0x1fa   : > { %v514_v42 = vpop.xlane.xlu1 %513 }
 0x1fb   : > { %v544_v44 = vmul.f32 0.0078125, %v514_v42  ;;  %999 = vrsqrt.f32 %v559_v34 }
 0x1fd   : > { %v560_v41 = vadd.f32 1e-05, %v544_v44 }
 0x1fe   : > { %v524_v46 = vpop.xlane.xlu0 %523 }
 0x1ff   : > { %1001 = vrsqrt.f32 %v560_v41  ;;  %v549_v48 = vmul.f32 0.0078125, %v524_v46 }
 0x201   : > { %v565_v57 = vadd.f32 1e-05, %v549_v48 }
 0x202   : > { %v526_v45 = vpop.xlane.xlu1 %525  ;;  %v520_v51 = vpop.xlane.xlu0 %519 }
 0x203   : > { %v550_v49 = vmul.f32 0.0078125, %v526_v45  ;;  %v547_v52 = vmul.f32 0.0078125, %v520_v51 }
 0x205   : > { %v566_v54 = vadd.f32 1e-05, %v550_v49  ;;  %v563_v55 = vadd.f32 1e-05, %v547_v52 }
 0x206   : > { %v522_v58 = vpop.xlane.xlu1 %521  ;;  %v532_v59 = vpop.xlane.xlu0 %531 }
 0x207   : > { %1003 = vrsqrt.f32 %v566_v54  ;;  %v548_v61 = vmul.f32 0.0078125, %v522_v58  ;;  %v553_v0 = vmul.f32 0.0078125, %v532_v59 }
 0x208   : > { %1005 = vrsqrt.f32 %v563_v55  ;;  %v1000_v63 = vpop.eup %999 }
 0x209   : > { %v564_v60 = vadd.f32 1e-05, %v548_v61  ;;  %1007 = vrsqrt.f32 %v565_v57  ;;  %v591_v11 = vmul.f32 %v1000_v63, %v1187_v29  ;;  %v569_v13 = vadd.f32 1e-05, %v553_v0 }
 0x20a   : > { %v534_v2 = vpop.xlane.xlu1 %533  ;;  %v528_v3 = vpop.xlane.xlu0 %527 }
 0x20b   : > { %1009 = vrsqrt.f32 %v564_v60  ;;  %v554_v4 = vmul.f32 0.0078125, %v534_v2  ;;  %v551_v5 = vmul.f32 0.0078125, %v528_v3 }
 0x20c   : > { %v1002_v6 = vpop.eup %1001 }
 0x20d   : > { %v570_v8 = vadd.f32 1e-05, %v554_v4  ;;  %v567_v9 = vadd.f32 1e-05, %v551_v5  ;;  %v592_v12 = vmul.f32 %v1002_v6, %v1192_v33 }
 0x20e   : > { %v530_v14 = vpop.xlane.xlu1 %529  ;;  %v516_v16 = vpop.xlane.xlu0 %515 }
 0x20f   : > { %v552_v17 = vmul.f32 0.0078125, %v530_v14  ;;  %v545_v18 = vmul.f32 0.0078125, %v516_v16  ;;  %v607_v20 = vpack.c.bf16 %v592_v12, %v591_v11  ;;  %1011 = vrsqrt.f32 %v570_v8 }
 0x210   : > { %1013 = vrsqrt.f32 %v567_v9 }
 0x211   : > { %v568_v21 = vadd.f32 1e-05, %v552_v17  ;;  %v561_v23 = vadd.f32 1e-05, %v545_v18  ;;  %949 = vmatprep.mubr.bf16.mxu0 %v607_v20  ;;  %1015 = vrsqrt.f32 %v569_v13 }
 0x212   : > { %v518_v22 = vpop.xlane.xlu1 %517  ;;  %v536_v28 = vpop.xlane.xlu0 %535 }
 0x213   : > { %1017 = vrsqrt.f32 %v568_v21  ;;  %v546_v24 = vmul.f32 0.0078125, %v518_v22  ;;  %v555_v31 = vmul.f32 0.0078125, %v536_v28 }
 0x214   : > { %v1004_v29 = vpop.eup %1003  ;;  %1019 = vrsqrt.f32 %v561_v23 }
 0x215   : > { %v1006_v32 = vpop.eup %1005  ;;  %v562_v33 = vadd.f32 1e-05, %v546_v24  ;;  %v571_v25 = vadd.f32 1e-05, %v555_v31  ;;  %v598_v42 = vmul.f32 %v1004_v29, %v1205_v47 }
 0x216   : > { %v538_v26 = vpop.xlane.xlu1 %537  ;;  %v540_v35 = vpop.xlane.xlu0 %539  ;;  %v595_v34 = vmul.f32 %v1006_v32, %v1200_v43 }
 0x217   : > { %v1008_v36 = vpop.eup %1007  ;;  %1021 = vrsqrt.f32 %v562_v33  ;;  %v556_v37 = vmul.f32 0.0078125, %v538_v26  ;;  %v557_v38 = vmul.f32 0.0078125, %v540_v35 }
 0x218   : > { %v1010_v39 = vpop.eup %1009  ;;  %1023 = vrsqrt.f32 %v571_v25  ;;  %v597_v45 = vmul.f32 %v1008_v36, %v1197_v40 }
 0x219   : > { %v572_v44 = vadd.f32 1e-05, %v556_v37  ;;  %v573_v41 = vadd.f32 1e-05, %v557_v38  ;;  %v596_v46 = vmul.f32 %v1010_v39, %v1208_v50 }
 0x21a   : > { %v542_v48 = vpop.xlane.xlu1 %541  ;;  %v610_v52 = vpack.c.bf16 %v598_v42, %v597_v45 }
 0x21b   : > { %1025 = vrsqrt.f32 %v572_v44  ;;  %v558_v51 = vmul.f32 0.0078125, %v542_v48  ;;  %v609_v49 = vpack.c.bf16 %v596_v46, %v595_v34 }
 0x21c   : > { %v1012_v54 = vpop.eup %1011  ;;  %1027 = vrsqrt.f32 %v573_v41 }
 0x21d   : > { %v574_v55 = vadd.f32 1e-05, %v558_v51  ;;  %953 = vmatprep.mubr.bf16.mxu1 %v609_v49  ;;  %v1014_v57 = vpop.eup %1013  ;;  %v602_v58 = vmul.f32 %v1012_v54, %v1218_v56 }
 0x21e   : > { %954 = vmatmul.mubr.bf16.vlgmr.msra.gmra.mxu1 %v610_v52  ;;  %v1016_v43 = vpop.eup %1015  ;;  %v599_v50 = vmul.f32 %v1014_v57, %v1228_v62 }
 0x21f   : > { %1029 = vrsqrt.f32 %v574_v55  ;;  %v601_v61 = vmul.f32 %v1016_v43, %v1215_v53 }
 0x220   : > { %v1018_v47 = vpop.eup %1017 }
 0x221   : > { %v600_v59 = vmul.f32 %v1018_v47, %v1231_v1  ;;  %v1020_v40 = vpop.eup %1019  ;;  %v612_v0 = vpack.c.bf16 %v602_v58, %v601_v61 }
 0x222   : > { %v593_v2 = vmul.f32 %v1020_v40, %v1241_v7 }
 0x223   : > { %v611_v60 = vpack.c.bf16 %v600_v59, %v599_v50 }
 0x224   : > { %v1022_v63 = vpop.eup %1021 }
 0x225   : > { %957 = vmatprep.mubr.bf16.mxu1 %v611_v60  ;;  %v594_v3 = vmul.f32 %v1022_v63, %v1244_v10  ;;  %v1024_v4 = vpop.eup %1023  ;;  %v876_v10 = vld [vmem:[%s1355_s4] ss:$0 sm:$0xff] }
 0x226   : > { %958 = vmatmul.mubr.bf16.gmra.mxu1 %v612_v0  ;;  %v603_v62 = vmul.f32 %v1024_v4, %v1251_v15 }
 0x227   : > { %v608_v5 = vpack.c.bf16 %v594_v3, %v593_v2 }
 0x228   : > { %v1026_v56 = vpop.eup %1025 }
 0x229   : > { %950 = vmatmul.mubr.bf16.vlgmr.msra.gmra.mxu0 %v608_v5  ;;  %v604_v1 = vmul.f32 %v1026_v56, %v1257_v19  ;;  %v1028_v6 = vpop.eup %1027 }
 0x22a   : > { %v605_v9 = vmul.f32 %v1028_v6, %v1264_v27 }
 0x22b   : > { %v613_v53 = vpack.c.bf16 %v604_v1, %v603_v62 }
 0x22c   : > { %v1030_v8 = vpop.eup %1029 }
 0x22d   : > { %961 = vmatprep.mubr.bf16.mxu1 %v613_v53  ;;  %v606_v7 = vmul.f32 %v1030_v8, %v1270_v30 }
 0x22f   : > { %v614_v11 = vpack.c.bf16 %v606_v7, %v605_v9 }
 0x231   : > { %962 = vmatmul.mubr.bf16.gmra.mxu1 %v614_v11 }
 0x2de   : > { %v955_v15 = vpop.f32.mrf.mxu1 }
 0x2df   : > { %v745_v19 = vadd.f32 %v955_v15, %v876_v10 }
 0x2e0   : > { %v736_v27 = vpop.f32.mrf.mxu1 }
 0x2e1   : > { %790 = vst.msk [vmem:[%s1314_s29 + $0x30] sm:$0xff] %vm783_vm1, %v745_v19  ;;  %v737_v30 = vadd.f32 %v876_v10, %v736_v27 }
 0x2e2   : > { %v956_v12 = vpop.f32.mrf.mxu1 }
 0x2e3   : > { %788 = vst.msk [vmem:[%s1314_s29 + $0x20] sm:$0xff] %vm783_vm1, %v737_v30  ;;  %v748_v13 = vadd.f32 %v956_v12, %v876_v10 }
 0x2e4   : > { %v739_v14 = vpop.f32.mrf.mxu1 }
 0x2e5   : > { %791 = vst.msk [vmem:[%s1314_s29 + $0x38] sm:$0xff] %vm783_vm1, %v748_v13  ;;  %v740_v16 = vadd.f32 %v876_v10, %v739_v14 }
 0x2e6   : > { %v959_v17 = vpop.f32.mrf.mxu1 }
 0x2e7   : > { %789 = vst.msk [vmem:[%s1314_s29 + $0x28] sm:$0xff] %vm783_vm1, %v740_v16  ;;  %v761_v18 = vadd.f32 %v959_v17, %v876_v10 }
 0x2e8   : > { %v752_v20 = vpop.f32.mrf.mxu1 }
 0x2e9   : > { %794 = vst.msk [vmem:[%s1314_s29 + $0x50] sm:$0xff] %vm783_vm1, %v761_v18  ;;  %v753_v21 = vadd.f32 %v876_v10, %v752_v20  ;;  %v951_v23 = vpop.f32.mrf.mxu0 }
 0x2ea   : > { %v729_v22 = vadd.f32 %v951_v23, %v876_v10  ;;  %v960_v28 = vpop.f32.mrf.mxu1 }
 0x2eb   : > { %792 = vst.msk [vmem:[%s1314_s29 + $0x40] sm:$0xff] %vm783_vm1, %v753_v21  ;;  %v764_v24 = vadd.f32 %v960_v28, %v876_v10  ;;  %v720_v31 = vpop.f32.mrf.mxu0 }
 0x2ec   : > { %786 = vst.msk [vmem:[%s1314_s29 + $0x10] sm:$0xff] %vm783_vm1, %v729_v22  ;;  %v721_v29 = vadd.f32 %v876_v10, %v720_v31  ;;  %v755_v32 = vpop.f32.mrf.mxu1 }
 0x2ed   : > { %795 = vst.msk [vmem:[%s1314_s29 + $0x58] sm:$0xff] %vm783_vm1, %v764_v24  ;;  %v756_v33 = vadd.f32 %v876_v10, %v755_v32  ;;  %v952_v25 = vpop.f32.mrf.mxu0 }
 0x2ee   : > { %784 = vst.msk [vmem:[%s1314_s29] sm:$0xff] %vm783_vm1, %v721_v29  ;;  %v732_v26 = vadd.f32 %v952_v25, %v876_v10 }
 0x2ef   : > { %793 = vst.msk [vmem:[%s1314_s29 + $0x48] sm:$0xff] %vm783_vm1, %v756_v33  ;;  %v723_v35 = vpop.f32.mrf.mxu0 }
 0x2f0   : > { %787 = vst.msk [vmem:[%s1314_s29 + $0x18] sm:$0xff] %vm783_vm1, %v732_v26  ;;  %v724_v36 = vadd.f32 %v876_v10, %v723_v35 }
 0x2f1   : > { %v963_v37 = vpop.f32.mrf.mxu1 }
 0x2f2   : > { %785 = vst.msk [vmem:[%s1314_s29 + $0x8] sm:$0xff] %vm783_vm1, %v724_v36  ;;  %v777_v38 = vadd.f32 %v963_v37, %v876_v10 }
 0x2f3   : > { %v768_v39 = vpop.f32.mrf.mxu1 }
 0x2f4   : > { %798 = vst.msk [vmem:[%s1314_s29 + $0x70] sm:$0xff] %vm783_vm1, %v777_v38  ;;  %v769_v34 = vadd.f32 %v876_v10, %v768_v39 }
 0x2f5   : > { %v964_v42 = vpop.f32.mrf.mxu1 }
 0x2f6   : > { %796 = vst.msk [vmem:[%s1314_s29 + $0x60] sm:$0xff] %vm783_vm1, %v769_v34  ;;  %v780_v44 = vadd.f32 %v964_v42, %v876_v10 }
 0x2f7   : > { %v771_v41 = vpop.f32.mrf.mxu1 }
 0x2f8   : > { %799 = vst.msk [vmem:[%s1314_s29 + $0x78] sm:$0xff] %vm783_vm1, %v780_v44  ;;  %v772_v46 = vadd.f32 %v876_v10, %v771_v41 }
 0x2fa   : > { %797 = vst.msk [vmem:[%s1314_s29 + $0x68] sm:$0xff] %vm783_vm1, %v772_v46 }
 0x2fb PF: > { %s15_s18 = sadd.s32 1, %s1037_s18  }
 0x2fc   : > { %p12_p4 = scmp.ge.s32.totalorder %s15_s18, 6  }
 0x2fe   :  { %14 = sbr.rel (!%p12_p4) target bundleno = 1 (0x1), region = 70 }

</bundles_post_ra>
